<compile_context>
chip_gen: v7x
topology: tpu7x:2x2x1
jax: 0.10.0
libtpu: 0.0.40
codegen_flags: <defaults>
</compile_context>

<pallas_src>
import functools

import numpy as np

import jax
import jax.numpy as jnp
from jax.experimental import pallas as pl
from jax.experimental.pallas import tpu as pltpu


# ----------------------------------------------------------------------------
# Fused polyphase decoder kernel
# ----------------------------------------------------------------------------
def _decoder_kernel(x_ref, w1p_ref, w2p_ref, w3p_ref, o_ref, *, lin):
    # x_ref  : (1, B*Lin)      latent, batch folded into lanes (col = b*Lin + m)
    # w1p_ref: (nc, 6)         layer-1 taps [v4, v2, v0, v3, v1, b1]  (ConvT 1->nc)
    # w2p_ref: (4nc, 4nc + 1)  layer-2 block-Toeplitz phase matrix | bias column
    # w3p_ref: (4, 6nc + 1)    layer-3 block-Toeplitz phase matrix | bias column
    # o_ref  : (4, B*Lin)      output phases: o[r, b*Lin + m] = y[b, 0, 4m + r]
    f32 = jnp.float32
    bl = x_ref.shape[1]
    nc = w1p_ref.shape[0]
    nb = bl // lin

    # O(L) per-batch-segment boundary masks (only in-kernel constants; one row each).
    lane = jax.lax.broadcasted_iota(jnp.int32, (1, bl), 1)
    last = lane == (lin - 1)
    first = lane == 0
    for b in range(1, nb):                      # nb is tiny and static
        last = jnp.logical_or(last, lane == b * lin + lin - 1)
        first = jnp.logical_or(first, lane == b * lin)
    mask_next = jnp.where(last, 0.0, 1.0).astype(f32)    # kills x[m+1] at m = Lin-1
    mask_prev = jnp.where(first, 0.0, 1.0).astype(f32)   # kills x[m-1] at m = 0

    def shift_next(v):   # out[:, m] = v[:, m+1] within each length-Lin segment, else 0
        nxt = jnp.concatenate([v[:, 1:], jnp.zeros_like(v[:, :1])], axis=1)
        return nxt * mask_next

    def shift_prev(v):   # out[:, m] = v[:, m-1] within each length-Lin segment, else 0
        prv = jnp.concatenate([jnp.zeros_like(v[:, :1]), v[:, :-1]], axis=1)
        return prv * mask_prev

    x = x_ref[...].astype(f32)                  # (1, BL)
    x_n = shift_next(x)
    x_p = shift_prev(x)

    # ---- Layer 1: ConvTranspose1d(1 -> nc, k=5, s=2, p=2, op=1) + ReLU ------
    # Polyphase: even output taps {4,2,0}, odd output taps {3,1}.  Cin == 1 so
    # this is 5 VPU broadcast FMAs over the whole batch; no MXU, no scratch.
    w1p = w1p_ref[...]
    b1 = w1p[:, 5:6]
    y1e = jnp.maximum(w1p[:, 0:1] * x_p + w1p[:, 1:2] * x + w1p[:, 2:3] * x_n + b1, 0.0)
    y1o = jnp.maximum(w1p[:, 3:4] * x + w1p[:, 4:5] * x_n + b1, 0.0)       # (nc, BL)

    # ---- Layer 2: ConvTranspose1d(nc -> nc, k=5, s=2, p=2, op=1) + ReLU -----
    # All 4 output phases for the whole batch in ONE (4nc,4nc)@(4nc,BL) matmul.
    x2 = jnp.concatenate([shift_prev(y1o), y1e, y1o, shift_next(y1e)], axis=0)
    w2p = w2p_ref[...]
    y2 = jnp.maximum(
        jnp.dot(w2p[:, :4 * nc], x2, preferred_element_type=f32)
        + w2p[:, 4 * nc:4 * nc + 1], 0.0)                                   # (4nc, BL)

    # ---- Layer 3: Conv1d(nc -> 1, k=3, p=1), no activation ------------------
    # Phase rows of y2: p0 = y2[0:nc], p1 = y2[nc:2nc], p2 = y2[2nc:3nc], p3 = y2[3nc:4nc].
    x3 = jnp.concatenate(
        [shift_prev(y2[3 * nc:4 * nc, :]), y2, shift_next(y2[0:nc, :])], axis=0)
    w3p = w3p_ref[...]
    q = (jnp.dot(w3p[:, :6 * nc], x3, preferred_element_type=f32)
         + w3p[:, 6 * nc:6 * nc + 1])                                        # (4, BL)

    o_ref[...] = q.astype(o_ref.dtype)          # single lane-dense store


# ----------------------------------------------------------------------------
# Wrapper: one grid-less pallas_call for the whole decoder
# ----------------------------------------------------------------------------
def decoder_forward(prepped, h):
    if h.ndim == 3:                             # (B, 1, Lin) -> (B, Lin)
        h = h[:, 0, :]
    h = h.astype(jnp.float32)
    bsz, lin = h.shape
    bl = bsz * lin
    x_flat = h.reshape(1, bl)                   # batch folded into lanes (free reshape)

    q = pl.pallas_call(
        functools.partial(_decoder_kernel, lin=lin),
        out_shape=jax.ShapeDtypeStruct((4, bl), jnp.float32),
        in_specs=[pl.BlockSpec(memory_space=pltpu.MemorySpace.VMEM)] * 4,
        out_specs=pl.BlockSpec(memory_space=pltpu.MemorySpace.VMEM),
    )(x_flat, prepped["w1p"], prepped["w2p"], prepped["w3p"])

    # Phase-major (4, B*Lin) -> interleaved (B, 1, 4*Lin): layout plumbing only,
    # done outside the kernel.
    return q.reshape(4, bsz, lin).transpose(1, 2, 0).reshape(bsz, 1, 4 * lin)


decoder_forward_jit = jax.jit(decoder_forward)


# ----------------------------------------------------------------------------
# Parameters (PyTorch layout) + one-time repack into kernel layout
# ----------------------------------------------------------------------------
def init_params(key, nchannels=16):
    def uinit(k, shape, fan_in):
        bound = 1.0 / float(np.sqrt(fan_in))
        return jax.random.uniform(k, shape, jnp.float32, -bound, bound)

    nc = nchannels
    ks = jax.random.split(key, 6)
    return {
        # ConvTranspose1d(1, nc, 5): weight (Cin, Cout, K)
        "dec0_w": uinit(ks[0], (1, nc, 5), nc * 5),
        "dec0_b": uinit(ks[1], (nc,), nc * 5),
        # ConvTranspose1d(nc, nc, 5)
        "dec1_w": uinit(ks[2], (nc, nc, 5), nc * 5),
        "dec1_b": uinit(ks[3], (nc,), nc * 5),
        # Conv1d(nc, 1, 3): weight (Cout, Cin, K)
        "dec2_w": uinit(ks[4], (1, nc, 3), nc * 3),
        "dec2_b": uinit(ks[5], (1,), nc * 3),
    }


def prep_decoder_params(params):
    """One-time repack of PyTorch-layout weights (hoisted out of the forward path).

    Layer 1 (ConvT 1->nc, v[c,t] = dec0_w[0,c,t]): columns [v4,v2,v0,v3,v1,b1] -> (nc,6)
    Layer 2 (ConvT nc->nc): block-Toeplitz phase matrix over stacked
        [y1o_prev, y1e, y1o, y1e_next], with Wt[co,ci] = dec1_w[ci,co,t]:
          [[W4 W2 W0 0], [0 W3 W1 0], [0 W4 W2 W0], [0 0 W3 W1]]  | bias col -> (4nc,4nc+1)
    Layer 3 (Conv1d nc->1, k=3, same): block-Toeplitz over stacked
        [p3_prev, p0, p1, p2, p3, p0_next], u_t = dec2_w[0,:,t]   | bias col -> (4,6nc+1)
    """
    f32 = jnp.float32
    nc = params["dec0_w"].shape[1]

    v = params["dec0_w"][0].astype(f32)                     # (nc, 5)
    b1 = params["dec0_b"].astype(f32).reshape(nc, 1)
    w1p = jnp.concatenate(
        [v[:, 4:5], v[:, 2:3], v[:, 0:1], v[:, 3:4], v[:, 1:2], b1], axis=1)

    W = params["dec1_w"].astype(f32)                        # (Cin=nc, Cout=nc, 5)
    Wt = [W[:, :, t].T for t in range(5)]                   # Wt[co, ci] = W[ci, co, t]
    Z = jnp.zeros((nc, nc), f32)
    w2big = jnp.concatenate([
        jnp.concatenate([Wt[4], Wt[2], Wt[0], Z], axis=1),  # phase y2[4m]
        jnp.concatenate([Z, Wt[3], Wt[1], Z], axis=1),      # phase y2[4m+1]
        jnp.concatenate([Z, Wt[4], Wt[2], Wt[0]], axis=1),  # phase y2[4m+2]
        jnp.concatenate([Z, Z, Wt[3], Wt[1]], axis=1),      # phase y2[4m+3]
    ], axis=0)
    b2big = jnp.tile(params["dec1_b"].astype(f32).reshape(nc, 1), (4, 1))
    w2p = jnp.concatenate([w2big, b2big], axis=1)           # (4nc, 4nc+1)

    u = params["dec2_w"][0].astype(f32)                     # (nc, 3)
    u0, u1, u2 = u[:, 0], u[:, 1], u[:, 2]
    z = jnp.zeros((nc,), f32)
    w3big = jnp.stack([
        jnp.concatenate([u0, u1, u2, z, z, z]),             # y3[4m]
        jnp.concatenate([z, u0, u1, u2, z, z]),             # y3[4m+1]
        jnp.concatenate([z, z, u0, u1, u2, z]),             # y3[4m+2]
        jnp.concatenate([z, z, z, u0, u1, u2]),             # y3[4m+3]
    ], axis=0)
    b3col = jnp.tile(params["dec2_b"].astype(f32).reshape(1, 1), (4, 1))
    w3p = jnp.concatenate([w3big, b3col], axis=1)           # (4, 6nc+1)

    return {"w1p": w1p, "w2p": w2p, "w3p": w3p}


# ----------------------------------------------------------------------------
# Independent numpy reference (direct PyTorch-definition scatter / correlate)
# ----------------------------------------------------------------------------
def _ref_conv_transpose1d(x, w, b, stride, padding, output_padding):
    bsz, cin, lin = x.shape
    _, cout, k = w.shape
    lout = (lin - 1) * stride - 2 * padding + k + output_padding
    full = np.zeros((bsz, cout, (lin - 1) * stride + k), np.float32)
    for i in range(lin):
        for t in range(k):
            full[:, :, i * stride + t] += x[:, :, i] @ w[:, :, t]
    return full[:, :, padding:padding + lout] + b[None, :, None]


def _ref_conv1d(x, w, b, padding):
    bsz, cin, length = x.shape
    cout, _, k = w.shape
    xp = np.pad(x, ((0, 0), (0, 0), (padding, padding)))
    lout = length + 2 * padding - k + 1
    y = np.zeros((bsz, cout, lout), np.float32)
    for t in range(k):
        y += np.einsum("bcl,oc->bol", xp[:, :, t:t + lout], w[:, :, t])
    return y + b[None, :, None]


def decoder_reference(params, h):
    x = np.asarray(h, np.float32)[:, None, :]
    x = np.maximum(_ref_conv_transpose1d(x, np.asarray(params["dec0_w"]),
                                         np.asarray(params["dec0_b"]), 2, 2, 1), 0.0)
    x = np.maximum(_ref_conv_transpose1d(x, np.asarray(params["dec1_w"]),
                                         np.asarray(params["dec1_b"]), 2, 2, 1), 0.0)
    return _ref_conv1d(x, np.asarray(params["dec2_w"]),
                       np.asarray(params["dec2_b"]), 1)


# ----------------------------------------------------------------------------
if __name__ == "__main__":
    key = jax.random.PRNGKey(0)
    pkey, hkey = jax.random.split(key)
    nc, bsz, lin = 16, 2, 32                    # latent length 32 -> output length 128

    params = init_params(pkey, nchannels=nc)
    prepped = prep_decoder_params(params)       # one-time weight repack (outside jit)

    h = jax.random.normal(hkey, (bsz, lin), dtype=jnp.float32)   # (B, L) latent

    y = decoder_forward_jit(prepped, h)
    y = jax.block_until_ready(y)

    assert y.shape == (bsz, 1, 4 * lin), f"unexpected output shape {y.shape}"
    assert bool(jnp.all(jnp.isfinite(y))), "non-finite values in output"

    # Correctness vs. a direct PyTorch-definition numpy reference.  Matmuls stay
    # f32, so typical error is ~1e-6; a structural (tap-ordering) bug would be
    # O(0.1-1), well outside this tolerance.
    y_ref = decoder_reference(params, np.asarray(h))
    np.testing.assert_allclose(np.asarray(y), y_ref, rtol=2e-2, atol=1e-2)

    print("KERNEL_OK")
</pallas_src>

<mosaic_0001>
module attributes {stable_mosaic.version = 11 : i64} {
  func.func @_decoder_kernel(%arg0: memref<1x64xf32, #tpu.memory_space<vmem>>, %arg1: memref<16x6xf32, #tpu.memory_space<vmem>>, %arg2: memref<64x65xf32, #tpu.memory_space<vmem>>, %arg3: memref<4x97xf32, #tpu.memory_space<vmem>>, %arg4: memref<4x64xf32, #tpu.memory_space<vmem>>) attributes {dimension_semantics = [], scalar_prefetch = 0 : i64, scratch_operands = 0 : i64, tpu.core_type = #tpu.core_type<tc>} {
    %0 = tpu.iota {dimensions = array<i32: 1>} : vector<1x64xi32>
    %c31_i32 = arith.constant 31 : i32
    %1 = vector.broadcast %c31_i32 : i32 to vector<1x64xi32>
    %2 = arith.cmpi eq, %0, %1 : vector<1x64xi32>
    %c0_i32 = arith.constant 0 : i32
    %3 = vector.broadcast %c0_i32 : i32 to vector<1x64xi32>
    %4 = arith.cmpi eq, %0, %3 : vector<1x64xi32>
    %c63_i32 = arith.constant 63 : i32
    %5 = vector.broadcast %c63_i32 : i32 to vector<1x64xi32>
    %6 = arith.cmpi eq, %0, %5 : vector<1x64xi32>
    %7 = arith.ori %2, %6 : vector<1x64xi1>
    %c32_i32 = arith.constant 32 : i32
    %8 = vector.broadcast %c32_i32 : i32 to vector<1x64xi32>
    %9 = arith.cmpi eq, %0, %8 : vector<1x64xi32>
    %10 = arith.ori %4, %9 : vector<1x64xi1>
    %cst = arith.constant 0.000000e+00 : f32
    %cst_0 = arith.constant 1.000000e+00 : f32
    %11 = vector.broadcast %cst : f32 to vector<1x64xf32>
    %12 = vector.broadcast %cst_0 : f32 to vector<1x64xf32>
    %13 = arith.select %7, %11, %12 : vector<1x64xi1>, vector<1x64xf32>
    %cst_1 = arith.constant 0.000000e+00 : f32
    %cst_2 = arith.constant 1.000000e+00 : f32
    %14 = vector.broadcast %cst_1 : f32 to vector<1x64xf32>
    %15 = vector.broadcast %cst_2 : f32 to vector<1x64xf32>
    %16 = arith.select %10, %14, %15 : vector<1x64xi1>, vector<1x64xf32>
    %c0 = arith.constant 0 : index
    %c0_3 = arith.constant 0 : index
    %17 = vector.load %arg0[%c0, %c0_3] : memref<1x64xf32, #tpu.memory_space<vmem>>, vector<1x64xf32>
    %18 = vector.extract_strided_slice %17 {offsets = [0, 1], sizes = [1, 63], strides = [1, 1]} : vector<1x64xf32> to vector<1x63xf32>
    %cst_4 = arith.constant 0.000000e+00 : f32
    %19 = vector.broadcast %cst_4 : f32 to vector<1x1xf32>
    %20 = tpu.concatenate %18, %19 in 1 : vector<1x63xf32>, vector<1x1xf32> -> vector<1x64xf32>
    %21 = arith.mulf %20, %13 : vector<1x64xf32>
    %cst_5 = arith.constant 0.000000e+00 : f32
    %22 = vector.broadcast %cst_5 : f32 to vector<1x1xf32>
    %23 = vector.extract_strided_slice %17 {offsets = [0, 0], sizes = [1, 63], strides = [1, 1]} : vector<1x64xf32> to vector<1x63xf32>
    %24 = tpu.concatenate %22, %23 in 1 : vector<1x1xf32>, vector<1x63xf32> -> vector<1x64xf32>
    %25 = arith.mulf %24, %16 : vector<1x64xf32>
    %c0_6 = arith.constant 0 : index
    %c0_7 = arith.constant 0 : index
    %26 = vector.load %arg1[%c0_6, %c0_7] : memref<16x6xf32, #tpu.memory_space<vmem>>, vector<16x6xf32>
    %27 = vector.extract_strided_slice %26 {offsets = [0, 5], sizes = [16, 1], strides = [1, 1]} : vector<16x6xf32> to vector<16x1xf32>
    %28 = vector.extract_strided_slice %26 {offsets = [0, 0], sizes = [16, 1], strides = [1, 1]} : vector<16x6xf32> to vector<16x1xf32>
    %29 = vector.broadcast %28 : vector<16x1xf32> to vector<16x64xf32>
    %30 = vector.broadcast %25 : vector<1x64xf32> to vector<16x64xf32>
    %31 = arith.mulf %29, %30 : vector<16x64xf32>
    %32 = vector.extract_strided_slice %26 {offsets = [0, 1], sizes = [16, 1], strides = [1, 1]} : vector<16x6xf32> to vector<16x1xf32>
    %33 = vector.broadcast %32 : vector<16x1xf32> to vector<16x64xf32>
    %34 = vector.broadcast %17 : vector<1x64xf32> to vector<16x64xf32>
    %35 = arith.mulf %33, %34 : vector<16x64xf32>
    %36 = arith.addf %31, %35 : vector<16x64xf32>
    %37 = vector.extract_strided_slice %26 {offsets = [0, 2], sizes = [16, 1], strides = [1, 1]} : vector<16x6xf32> to vector<16x1xf32>
    %38 = vector.broadcast %37 : vector<16x1xf32> to vector<16x64xf32>
    %39 = vector.broadcast %21 : vector<1x64xf32> to vector<16x64xf32>
    %40 = arith.mulf %38, %39 : vector<16x64xf32>
    %41 = arith.addf %36, %40 : vector<16x64xf32>
    %42 = vector.broadcast %27 : vector<16x1xf32> to vector<16x64xf32>
    %43 = arith.addf %41, %42 : vector<16x64xf32>
    %cst_8 = arith.constant 0.000000e+00 : f32
    %44 = vector.broadcast %cst_8 : f32 to vector<16x64xf32>
    %45 = arith.maximumf %43, %44 : vector<16x64xf32>
    %46 = vector.extract_strided_slice %26 {offsets = [0, 3], sizes = [16, 1], strides = [1, 1]} : vector<16x6xf32> to vector<16x1xf32>
    %47 = vector.broadcast %46 : vector<16x1xf32> to vector<16x64xf32>
    %48 = vector.broadcast %17 : vector<1x64xf32> to vector<16x64xf32>
    %49 = arith.mulf %47, %48 : vector<16x64xf32>
    %50 = vector.extract_strided_slice %26 {offsets = [0, 4], sizes = [16, 1], strides = [1, 1]} : vector<16x6xf32> to vector<16x1xf32>
    %51 = vector.broadcast %50 : vector<16x1xf32> to vector<16x64xf32>
    %52 = vector.broadcast %21 : vector<1x64xf32> to vector<16x64xf32>
    %53 = arith.mulf %51, %52 : vector<16x64xf32>
    %54 = arith.addf %49, %53 : vector<16x64xf32>
    %55 = vector.broadcast %27 : vector<16x1xf32> to vector<16x64xf32>
    %56 = arith.addf %54, %55 : vector<16x64xf32>
    %cst_9 = arith.constant 0.000000e+00 : f32
    %57 = vector.broadcast %cst_9 : f32 to vector<16x64xf32>
    %58 = arith.maximumf %56, %57 : vector<16x64xf32>
    %cst_10 = arith.constant 0.000000e+00 : f32
    %59 = vector.broadcast %cst_10 : f32 to vector<16x1xf32>
    %60 = vector.extract_strided_slice %58 {offsets = [0, 0], sizes = [16, 63], strides = [1, 1]} : vector<16x64xf32> to vector<16x63xf32>
    %61 = tpu.concatenate %59, %60 in 1 : vector<16x1xf32>, vector<16x63xf32> -> vector<16x64xf32>
    %62 = vector.broadcast %16 : vector<1x64xf32> to vector<16x64xf32>
    %63 = arith.mulf %61, %62 : vector<16x64xf32>
    %64 = vector.extract_strided_slice %45 {offsets = [0, 1], sizes = [16, 63], strides = [1, 1]} : vector<16x64xf32> to vector<16x63xf32>
    %cst_11 = arith.constant 0.000000e+00 : f32
    %65 = vector.broadcast %cst_11 : f32 to vector<16x1xf32>
    %66 = tpu.concatenate %64, %65 in 1 : vector<16x63xf32>, vector<16x1xf32> -> vector<16x64xf32>
    %67 = vector.broadcast %13 : vector<1x64xf32> to vector<16x64xf32>
    %68 = arith.mulf %66, %67 : vector<16x64xf32>
    %69 = tpu.concatenate %63, %45, %58, %68 in 0 : vector<16x64xf32>, vector<16x64xf32>, vector<16x64xf32>, vector<16x64xf32> -> vector<64x64xf32>
    %c0_12 = arith.constant 0 : index
    %c0_13 = arith.constant 0 : index
    %70 = vector.load %arg2[%c0_12, %c0_13] : memref<64x65xf32, #tpu.memory_space<vmem>>, vector<64x65xf32>
    %71 = vector.extract_strided_slice %70 {offsets = [0, 0], sizes = [64, 64], strides = [1, 1]} : vector<64x65xf32> to vector<64x64xf32>
    %cst_14 = arith.constant dense<0.000000e+00> : vector<64x64xf32>
    %72 = tpu.matmul %71, %69, %cst_14 {dimension_numbers = #tpu.dot_dimension_numbers<[1], [0], [0], [1], [0, 0, 1, 1], [], []>} : vector<64x64xf32>, vector<64x64xf32>, vector<64x64xf32> -> vector<64x64xf32>
    %73 = vector.extract_strided_slice %70 {offsets = [0, 64], sizes = [64, 1], strides = [1, 1]} : vector<64x65xf32> to vector<64x1xf32>
    %74 = vector.broadcast %73 : vector<64x1xf32> to vector<64x64xf32>
    %75 = arith.addf %72, %74 : vector<64x64xf32>
    %cst_15 = arith.constant 0.000000e+00 : f32
    %76 = vector.broadcast %cst_15 : f32 to vector<64x64xf32>
    %77 = arith.maximumf %75, %76 : vector<64x64xf32>
    %78 = vector.extract_strided_slice %77 {offsets = [48, 0], sizes = [16, 64], strides = [1, 1]} : vector<64x64xf32> to vector<16x64xf32>
    %cst_16 = arith.constant 0.000000e+00 : f32
    %79 = vector.broadcast %cst_16 : f32 to vector<16x1xf32>
    %80 = vector.extract_strided_slice %78 {offsets = [0, 0], sizes = [16, 63], strides = [1, 1]} : vector<16x64xf32> to vector<16x63xf32>
    %81 = tpu.concatenate %79, %80 in 1 : vector<16x1xf32>, vector<16x63xf32> -> vector<16x64xf32>
    %82 = vector.broadcast %16 : vector<1x64xf32> to vector<16x64xf32>
    %83 = arith.mulf %81, %82 : vector<16x64xf32>
    %84 = vector.extract_strided_slice %77 {offsets = [0, 0], sizes = [16, 64], strides = [1, 1]} : vector<64x64xf32> to vector<16x64xf32>
    %85 = vector.extract_strided_slice %84 {offsets = [0, 1], sizes = [16, 63], strides = [1, 1]} : vector<16x64xf32> to vector<16x63xf32>
    %cst_17 = arith.constant 0.000000e+00 : f32
    %86 = vector.broadcast %cst_17 : f32 to vector<16x1xf32>
    %87 = tpu.concatenate %85, %86 in 1 : vector<16x63xf32>, vector<16x1xf32> -> vector<16x64xf32>
    %88 = vector.broadcast %13 : vector<1x64xf32> to vector<16x64xf32>
    %89 = arith.mulf %87, %88 : vector<16x64xf32>
    %90 = tpu.concatenate %83, %77, %89 in 0 : vector<16x64xf32>, vector<64x64xf32>, vector<16x64xf32> -> vector<96x64xf32>
    %c0_18 = arith.constant 0 : index
    %c0_19 = arith.constant 0 : index
    %91 = vector.load %arg3[%c0_18, %c0_19] : memref<4x97xf32, #tpu.memory_space<vmem>>, vector<4x97xf32>
    %92 = vector.extract_strided_slice %91 {offsets = [0, 0], sizes = [4, 96], strides = [1, 1]} : vector<4x97xf32> to vector<4x96xf32>
    %cst_20 = arith.constant dense<0.000000e+00> : vector<4x64xf32>
    %93 = tpu.matmul %92, %90, %cst_20 {dimension_numbers = #tpu.dot_dimension_numbers<[1], [0], [0], [1], [0, 0, 1, 1], [], []>} : vector<4x96xf32>, vector<96x64xf32>, vector<4x64xf32> -> vector<4x64xf32>
    %94 = vector.extract_strided_slice %91 {offsets = [0, 96], sizes = [4, 1], strides = [1, 1]} : vector<4x97xf32> to vector<4x1xf32>
    %95 = vector.broadcast %94 : vector<4x1xf32> to vector<4x64xf32>
    %96 = arith.addf %93, %95 : vector<4x64xf32>
    %c0_21 = arith.constant 0 : index
    %c0_22 = arith.constant 0 : index
    %97 = vector.load %arg4[%c0_21, %c0_22] : memref<4x64xf32, #tpu.memory_space<vmem>>, vector<4x64xf32>
    tpu.vector_store %arg4[%c0_21, %c0_22], %96 {strides = array<i32>} : memref<4x64xf32, #tpu.memory_space<vmem>>, vector<4x64xf32>,
    return
  }
}

</mosaic_0001>

<bundles_post_ra>
// kernel: decoder_forward.1
= control target key start
LH: loop header
LB: loop body
LE: loop exit
PB: predicated region body
PF: predicated region fallthrough
CT: control target
= control target key end

     0   :  { %9 = vsyncpa [#allocation3], 0  ;;  %s637_s15 = smov [#allocation2]   ;;  %s756_s0 = inlined_call_operand.vmem [shape: f32[1,64], index: 0, kind: input, shape index: {}]   ;;  %s757_s1 = inlined_call_operand.vmem [shape: f32[16,6], index: 1, kind: input, shape index: {}]   ;;  %s758_s2 = inlined_call_operand.hbm [shape: f32[64,65], index: 2, kind: input, shape index: {}]   ;;  %s759_s3 = inlined_call_operand.vmem [shape: f32[4,97], index: 3, kind: input, shape index: {}]   ;;  %s760_s4 = inlined_call_operand.vmem [shape: f32[4,64], index: 4, kind: output, shape index: {}]  }
   0x1   :  { %s19_s16 = sshll.u32 %s637_s15, 4  ;;  %s613_s19 = scalar_lea.hbm %s758_s2, 1024  ;;  %s20_s16 = int_to_ptr.vmem [resolvable:$true] %s19_s16 }
   0x2   :  { %p614_p0 = scmp.ne.s32.totalorder %s758_s2, %s613_s19  ;;  %p617_p1 = scmp.lt.u32.totalorder %s613_s19, %s758_s2 }
   0x4   :  { %p619_p2 = pnand %p617_p1, %p614_p0 }
   0x6   :  { %622 = shalt.err (!%p619_p2)
}
   0x7   :  { %s623_s24 = scalar_lea.vmem %s20_s16, 1024  ;;  %p628_p4 = scmp.lt.s32.totalorder %s20_s16, %s20_s16 }
   0x8   :  { %p624_p3 = scmp.ne.s32.totalorder %s20_s16, %s623_s24  ;;  %p629_p5 = scmp.lt.s32.totalorder %s623_s24, %s623_s24 }
   0xa   :  { %p630_p6 = por %p629_p5, %p628_p4 }
   0xc   :  { %p631_p7 = pnand %p630_p6, %p624_p3 }
   0xe   :  { %634 = shalt.err (!%p631_p7)
}
   0xf   :  { %s638_s25 = smov 128   ;;  %s639_s26 = smov 8  }
  0x10   :  { %25 = dma.hbm_to_vmem [thread:$0]  %s758_s2, 1024, %s20_s16, [#allocation3], %s638_s25, %s638_s25, %s639_s26  }
  0x11   :  { %635 = dma.done.wait [#allocation3], 1024  }
  0x12   :  { %636 = vsyncadd [#allocation3], 4294966272  ;;  %v640_v0 = vmov 4   ;;  %v641_v1 = vmov 3   ;;  %v59_v2 = vld [vmem:[%s757_s1] sm:$0xff]  ;;  %v60_v3 = vld [vmem:[%s757_s1 + $0x8] sm:$0xff]  ;;  %v31_v9 = vlaneseq }
  0x13   :  { %602 = vset.pattern.permute.xlu1 %v640_v0  ;;  %601 = vset.pattern.permute.xlu0 %v641_v1  ;;  %v700_v4 = vld [vmem:[%s756_s0] ss:$0 sm:$0xff]  ;;  %v642_v5 = vmov 5   ;;  %s643_s8 = smov 127   ;;  %v644_v6 = vmov 0   ;;  %v645_v7 = vmov 1  }
  0x14   :  { %129 = vperm.xlu1 %602, %v59_v2   ;;  %119 = vperm.xlu0 %601, %v59_v2   ;;  %v646_v8 = vmov 2   ;;  %s647_s0 = smov 1   ;;  %v32_v10 = vand.u32 127, %v31_v9  ;;  %v72_v15 = vshrl.u32 %v31_v9, 7  ;;  %vm50_vm3 = vcmask 515072   ;;  %v168_v55 = vld [vmem:[#allocation2] sm:$0xff] }
  0x15   :  { %v648_v16 = vmov 1.0   ;;  %vm56_vm7 = vcmask 7168   ;;  %vm216_vm8 = vcmask 523264   ;;  %v174_v63 = vld [vmem:[#allocation2 + $0x30] sm:$0xff]  ;;  %v175_v0 = vld [vmem:[#allocation2 + $0x38] sm:$0xff]  ;;  %v649_v1 = vmov 64  }
  0x16   :  { %vm33_vm0 = vcmp.eq.s32.totalorder %v32_v10, 31  ;;  %vm35_vm1 = vcmp.eq.s32.totalorder %v32_v10, 63  ;;  %v73_v18 = vsub.s32 0, %v72_v15  ;;  %vm34_vm4 = vcmp.eq.s32.totalorder %v32_v10, 0  ;;  %511 = vmatprep.mubr.msk.f32.mxu0 %vm216_vm8, %v168_v55 }
  0x17   :  { %vm36_vm2 = vmor %vm33_vm0, %vm35_vm1  ;;  %vm37_vm5 = vcmp.eq.s32.totalorder %v32_v10, 32  ;;  %vm651_vm9 = vmmov 0   ;;  %vm376_vm10 = vcmask 785408   ;;  %vm449_vm11 = vcmask 519168  }
  0x18   :  { %133 = vperm.xlu1 %602, %v60_v3   ;;  %123 = vperm.xlu0 %601, %v60_v3   ;;  %v706_v17 = vsel %vm36_vm2, 0.0, %v648_v16  ;;  %vm38_vm6 = vmor %vm34_vm4, %vm37_vm5 }
  0x19   :  { %v714_v40 = vsel %vm38_vm6, 0.0, %v648_v16 }
  0x1c   :  { %603 = vset.pattern.permute.xlu1 %v642_v5  ;;  %47 = vrot.lane.b32.xlu0 %v700_v4, %s643_s8 }
  0x1d   :  { %107 = vperm.xlu1 %603, %v59_v2   ;;  %604 = vset.pattern.permute.xlu0 %v642_v5 }
  0x20   :  { %111 = vperm.xlu0 %604, %v60_v3  }
  0x21   :  { %605 = vset.pattern.permute.xlu1 %v644_v6 }
  0x22   :  { %63 = vperm.xlu1 %605, %v59_v2  }
  0x24   :  { %606 = vset.pattern.permute.xlu0 %v645_v7 }
  0x25   :  { %78 = vperm.xlu0 %606, %v59_v2  }
  0x26   :  { %68 = vperm.xlu1 %605, %v60_v3  }
  0x29   :  { %608 = vset.pattern.permute.xlu0 %v646_v8 }
  0x2a   :  { %607 = vset.pattern.permute.xlu1 %v645_v7  ;;  %91 = vperm.xlu0 %608, %v59_v2   ;;  %v170_v2 = vld [vmem:[#allocation2 + $0x10] sm:$0xff] }
  0x2b   :  { %82 = vperm.xlu1 %607, %v60_v3  }
  0x2e   :  { %611 = vset.pattern.permute.xlu0 %v649_v1 }
  0x2f   :  { %53 = vrot.lane.b32.xlu1 %v700_v4, %s647_s0 }
  0x30   :  { %609 = vset.pattern.permute.xlu1 %v646_v8 }
  0x33   :  { %95 = vperm.xlu1 %609, %v60_v3   ;;  %v169_v3 = vld [vmem:[#allocation2 + $0x8] sm:$0xff] }
  0x37   :  { %610 = vset.pattern.permute.xlu1 %v649_v1 }
  0x93   :  { %v130_v11 = vpop.permute.xlu1 %129  ;;  %v120_v12 = vpop.permute.xlu0 %119 }
  0x94   :  { %v126_v24 = vmul.f32 %v700_v4, %v120_v12 }
  0x97   :  { %v134_v13 = vpop.permute.xlu1 %133  ;;  %v124_v14 = vpop.permute.xlu0 %123 }
  0x98   :  { %v127_v25 = vmul.f32 %v700_v4, %v124_v14 }
  0x9b   :  { %v48_v19 = vpop.permute.xlu0 %47 }
  0x9c   :  { %v51_v20 = vsel %vm50_vm3, %v48_v19, 0.0  ;;  %v108_v21 = vpop.permute.xlu1 %107 }
  0x9d   :  { %v52_v22 = vmul.f32 %v51_v20, %v706_v17  ;;  %v172_v20 = vld [vmem:[#allocation2 + $0x20] sm:$0xff] }
  0x9f   :  { %v101_v23 = vrot.slane %v52_v22, %v73_v18  ;;  %v112_v31 = vpop.permute.xlu0 %111 }
  0xa1   :  { %v136_v26 = vmul.f32 %v130_v11, %v101_v23  ;;  %v64_v27 = vpop.permute.xlu1 %63  ;;  %v137_v28 = vmul.f32 %v134_v13, %v101_v23 }
  0xa3   :  { %v138_v29 = vadd.f32 %v136_v26, %v126_v24  ;;  %v139_v30 = vadd.f32 %v137_v28, %v127_v25 }
  0xa4   :  { %v79_v39 = vpop.permute.xlu0 %78 }
  0xa5   :  { %v140_v32 = vadd.f32 %v138_v29, %v108_v21  ;;  %v141_v33 = vadd.f32 %v139_v30, %v112_v31  ;;  %v69_v34 = vpop.permute.xlu1 %68  ;;  %v86_v47 = vmul.f32 %v700_v4, %v79_v39 }
  0xa7   :  { %v142_v35 = vmax.f32 %v140_v32, 0.0  ;;  %v143_v36 = vmax.f32 %v141_v33, 0.0 }
  0xa9   :  { %148 = vrot.lane.b32.xlu0 %v143_v36, %s647_s0  ;;  %146 = vrot.lane.b32.xlu1 %v142_v35, %s647_s0  ;;  %v558_v37 = vpack.c.bf16 %v143_v36, %v142_v35  ;;  %v92_v45 = vpop.permute.xlu0 %91 }
  0xaa   :  { %v83_v38 = vpop.permute.xlu1 %82  ;;  %v102_v51 = vmul.f32 %v101_v23, %v92_v45 }
  0xab   :  { %v87_v48 = vmul.f32 %v700_v4, %v83_v38  ;;  %v171_v4 = vld [vmem:[#allocation2 + $0x18] sm:$0xff] }
  0xae   :  { %v54_v41 = vpop.permute.xlu1 %53 }
  0xaf   :  { %v57_v42 = vsel %vm56_vm7, 0.0, %v54_v41  ;;  %v650_v41 = vmov 0.0|0.0  }
  0xb0   :  { %v58_v43 = vmul.f32 %v57_v42, %v714_v40  ;;  %566 = vmatprep.subr.bf16.mxu1 %v650_v41 }
  0xb2   :  { %v74_v44 = vrot.slane %v58_v43, %v73_v18  ;;  %v96_v46 = vpop.permute.xlu1 %95 }
  0xb3   :  { %v103_v54 = vmul.f32 %v101_v23, %v96_v46 }
  0xb4   :  { %v75_v49 = vmul.f32 %v74_v44, %v64_v27  ;;  %v76_v50 = vmul.f32 %v74_v44, %v69_v34 }
  0xb6   :  { %v88_v52 = vadd.f32 %v86_v47, %v75_v49  ;;  %v89_v53 = vadd.f32 %v87_v48, %v76_v50 }
  0xb8   :  { %v105_v56 = vadd.f32 %v103_v54, %v89_v53  ;;  %v104_v57 = vadd.f32 %v102_v51, %v88_v52  ;;  %v652_v53 = vmov 0.0   ;;  %v370_v54 = vld [vmem:[%s759_s3] sm:$0xf] }
  0xb9   :  { %547 = vmatprep.mubr.msk.f32.mxu1 %vm651_vm9, %v652_v53 }
  0xba   :  { %v114_v58 = vadd.f32 %v108_v21, %v104_v57  ;;  %v115_v59 = vadd.f32 %v112_v31, %v105_v56  ;;  %v173_v21 = vld [vmem:[#allocation2 + $0x28] sm:$0xff] }
  0xbc   :  { %v116_v60 = vmax.f32 %v114_v58, 0.0  ;;  %v117_v61 = vmax.f32 %v115_v59, 0.0 }
  0xbe   :  { %158 = vrot.lane.b32.xlu1 %v116_v60, %s643_s8  ;;  %160 = vrot.lane.b32.xlu0 %v117_v61, %s643_s8  ;;  %v554_v62 = vpack.c.bf16 %v117_v61, %v116_v60 }
  0xc2   :  { %208 = vperm.xlu1 %610, %v174_v63   ;;  %213 = vperm.xlu0 %611, %v175_v0  }
  0xc6   :  { %178 = vperm.xlu1 %610, %v168_v55   ;;  %188 = vperm.xlu0 %611, %v170_v2   ;;  %v653_v55 = vmov 96  }
  0xca   :  { %183 = vperm.xlu1 %610, %v169_v3  }
  0xce   :  { %193 = vperm.xlu1 %610, %v171_v4  }
 0x11b   :  { %v149_v5 = vpop.permute.xlu0 %148  ;;  %v147_v6 = vpop.permute.xlu1 %146 }
 0x11c   :  { %v153_v7 = vsel %vm56_vm7, 0.0, %v149_v5  ;;  %v152_v8 = vsel %vm56_vm7, 0.0, %v147_v6 }
 0x11d   :  { %v155_v9 = vmul.f32 %v153_v7, %v714_v40  ;;  %v154_v10 = vmul.f32 %v152_v8, %v714_v40 }
 0x11f   :  { %v550_v11 = vpack.c.bf16 %v155_v9, %v154_v10 }
 0x121   :  { %551 = vmatprep.subr.bf16.mxu0 %v550_v11 }
 0x122   :  { %553 = vmatpush3.bf16.msra.mxu0 %v550_v11 }
 0x123   :  { %555 = vmatprep.subr.bf16.mxu0 %v554_v62 }
 0x126   :  { %557 = vmatpush3.bf16.msra.mxu0 %v554_v62 }
 0x127   :  { %559 = vmatprep.subr.bf16.mxu0 %v558_v37 }
 0x12a   :  { %561 = vmatpush3.bf16.msra.mxu0 %v558_v37 }
 0x130   :  { %v159_v12 = vpop.permute.xlu1 %158  ;;  %v161_v13 = vpop.permute.xlu0 %160 }
 0x131   :  { %v164_v14 = vsel %vm50_vm3, %v159_v12, 0.0  ;;  %v165_v15 = vsel %vm50_vm3, %v161_v13, 0.0 }
 0x132   :  { %v166_v16 = vmul.f32 %v164_v14, %v706_v17  ;;  %v167_v18 = vmul.f32 %v165_v15, %v706_v17 }
 0x134   :  { %v562_v19 = vpack.c.bf16 %v167_v18, %v166_v16 }
 0x136   :  { %563 = vmatprep.subr.bf16.mxu0 %v562_v19 }
 0x137   :  { %565 = vmatpush3.bf16.msra.mxu0 %v562_v19 }
 0x13a   :  { %512 = vmatmul.mubr.msk.f32.vlgmr.msra.gmra.mrb[0].mxu0 %vm216_vm8, %v169_v3 }
 0x13b   :  { %514 = vmatprep.mubr.msk.f32.mxu0 %vm216_vm8, %v170_v2 }
 0x13e   :  { %515 = vmatmul.mubr.msk.f32.gmra.mrb[2].mxu0 %vm216_vm8, %v171_v4 }
 0x13f   :  { %517 = vmatprep.mubr.msk.f32.mxu0 %vm216_vm8, %v172_v20 }
 0x141   :  { %v209_v22 = vpop.permute.xlu1 %208  ;;  %v214_v25 = vpop.permute.xlu0 %213 }
 0x142   :  { %518 = vmatmul.mubr.msk.f32.gmra.mrb[4].mxu0 %vm216_vm8, %v173_v21 }
 0x143   :  { %520 = vmatprep.mubr.msk.f32.mxu0 %vm216_vm8, %v174_v63 }
 0x145   :  { %v179_v23 = vpop.permute.xlu1 %178  ;;  %v189_v32 = vpop.permute.xlu0 %188 }
 0x146   :  { %521 = vmatmul.mubr.msk.f32.gmra.mrb[6].mxu0 %vm216_vm8, %v175_v0 }
 0x149   :  { %v184_v24 = vpop.permute.xlu1 %183 }
 0x14d   :  { %v194_v30 = vpop.permute.xlu1 %193 }
 0x20d   :  { %v513_v26 = vpop.f32.mrb[0].mxu0 }
 0x20e   :  { %v305_v27 = vadd.f32 %v513_v26, %v184_v24  ;;  %v299_v28 = vpop.f32.mrb[1].mxu0 }
 0x20f   :  { %v300_v29 = vadd.f32 %v299_v28, %v179_v23 }
 0x210   :  { %v339_v31 = vmax.f32 %v305_v27, 0.0 }
 0x211   :  { %v338_v33 = vmax.f32 %v300_v29, 0.0  ;;  %v516_v34 = vpop.f32.mrb[2].mxu0 }
 0x212   :  { %v315_v35 = vadd.f32 %v516_v34, %v194_v30  ;;  %v309_v36 = vpop.f32.mrb[3].mxu0 }
 0x213   :  { %v570_v37 = vpack.c.bf16 %v339_v31, %v338_v33  ;;  %v310_v38 = vadd.f32 %v309_v36, %v189_v32 }
 0x214   :  { %v341_v39 = vmax.f32 %v315_v35, 0.0 }
 0x215   :  { %v340_v42 = vmax.f32 %v310_v38, 0.0  ;;  %v519_v43 = vpop.f32.mrb[4].mxu0 }
 0x216   :  { %v319_v44 = vpop.f32.mrb[5].mxu0 }
 0x217   :  { %v573_v45 = vpack.c.bf16 %v341_v39, %v340_v42 }
 0x219   :  { %v522_v46 = vpop.f32.mrb[6].mxu0 }
 0x21a   :  { %v335_v47 = vadd.f32 %v522_v46, %v214_v25  ;;  %v329_v48 = vpop.f32.mrb[7].mxu0 }
 0x21b   :  { %v330_v49 = vadd.f32 %v329_v48, %v209_v22 }
 0x21c   :  { %v345_v50 = vmax.f32 %v335_v47, 0.0 }
 0x21d   :  { %v344_v51 = vmax.f32 %v330_v49, 0.0 }
 0x21e   :  { %350 = vrot.lane.b32.xlu1 %v345_v50, %s647_s0 }
 0x21f   :  { %v579_v52 = vpack.c.bf16 %v345_v50, %v344_v51  ;;  %348 = vrot.lane.b32.xlu0 %v344_v51, %s647_s0 }
 0x222   :  { %203 = vperm.xlu1 %610, %v173_v21  }
 0x223   :  { %198 = vperm.xlu0 %611, %v172_v20  }
 0x226   :  { %362 = vrot.lane.b32.xlu1 %v339_v31, %s643_s8 }
 0x227   :  { %360 = vrot.lane.b32.xlu0 %v338_v33, %s643_s8 }
 0x228   :  { %612 = vset.pattern.permute.xlu0 %v653_v55 }
 0x22b   :  { %373 = vperm.xlu0 %612, %v370_v54  }
 0x290   :  { %v351_v56 = vpop.permute.xlu1 %350 }
 0x291   :  { %v355_v57 = vsel %vm56_vm7, 0.0, %v351_v56  ;;  %v349_v58 = vpop.permute.xlu0 %348 }
 0x292   :  { %v357_v59 = vmul.f32 %v355_v57, %v714_v40  ;;  %v354_v60 = vsel %vm56_vm7, 0.0, %v349_v58 }
 0x293   :  { %v356_v61 = vmul.f32 %v354_v60, %v714_v40 }
 0x295   :  { %v567_v62 = vpack.c.bf16 %v357_v59, %v356_v61 }
 0x297   :  { %568 = vmatpush3.bf16.msra.mxu1 %v567_v62 }
 0x298   :  { %569 = vmatprep.subr.bf16.mxu1 %v650_v41 }
 0x29b   :  { %571 = vmatpush3.bf16.msra.mxu1 %v570_v37 }
 0x29c   :  { %572 = vmatprep.subr.bf16.mxu1 %v650_v41 }
 0x29f   :  { %574 = vmatpush3.bf16.msra.mxu1 %v573_v45 }
 0x2a0   :  { %575 = vmatprep.subr.bf16.mxu1 %v650_v41 }
 0x2a1   :  { %v204_v63 = vpop.permute.xlu1 %203 }
 0x2a2   :  { %v325_v0 = vadd.f32 %v519_v43, %v204_v63  ;;  %v199_v1 = vpop.permute.xlu0 %198 }
 0x2a3   :  { %v320_v2 = vadd.f32 %v319_v44, %v199_v1 }
 0x2a4   :  { %v343_v3 = vmax.f32 %v325_v0, 0.0 }
 0x2a5   :  { %v342_v4 = vmax.f32 %v320_v2, 0.0  ;;  %v363_v5 = vpop.permute.xlu1 %362 }
 0x2a6   :  { %v361_v6 = vpop.permute.xlu0 %360  ;;  %v367_v8 = vsel %vm50_vm3, %v363_v5, 0.0 }
 0x2a7   :  { %v576_v7 = vpack.c.bf16 %v343_v3, %v342_v4  ;;  %v366_v40 = vsel %vm50_vm3, %v361_v6, 0.0  ;;  %v369_v9 = vmul.f32 %v367_v8, %v706_v17 }
 0x2a8   :  { %v368_v10 = vmul.f32 %v366_v40, %v706_v17 }
 0x2a9   :  { %577 = vmatpush3.bf16.msra.mxu1 %v576_v7 }
 0x2aa   :  { %578 = vmatprep.subr.bf16.mxu1 %v650_v41  ;;  %v582_v11 = vpack.c.bf16 %v369_v9, %v368_v10  ;;  %v374_v12 = vpop.permute.xlu0 %373 }
 0x2ad   :  { %580 = vmatpush3.bf16.msra.mxu1 %v579_v52 }
 0x2ae   :  { %581 = vmatprep.subr.bf16.mxu1 %v650_v41 }
 0x2b1   :  { %583 = vmatpush3.bf16.msra.mxu1 %v582_v11 }
 0x2b4   :  { %548 = vmatmul.mubr.msk.f32.vlgmr.msra.gmra.mrb[0].mxu1 %vm376_vm10, %v370_v54 }
 0x387   :  { %v445_v13 = vpop.f32.mrb[0].mxu1 }
 0x388   :  { %v446_v14 = vadd.f32 %v445_v13, %v374_v12  ;;  %v549_v15 = vpop.f32.mrb[1].mxu1 }
 0x38a   :  { %450 = vst.msk [vmem:[%s760_s4] sm:$0xf] %vm449_vm11, %v446_v14 }
 0x38b   :  { %455 = vsyncpa [#allocation3], 1 }

</bundles_post_ra>
